<compile_context>
chip_gen: v5e
topology: v5e:2x2
jax: 0.10.0
libtpu: 0.0.40
codegen_flags: <defaults>
</compile_context>

<pallas_src>
import functools

import jax
import jax.numpy as jnp
import numpy as np
from jax import lax
from jax.experimental import pallas as pl
from jax.experimental.pallas import tpu as pltpu


def _round_up(x, m):
    return (x + m - 1) // m * m


def _cdiv(a, b):
    return -(-a // b)


def _vmem_budget_bytes():
    """Generation-aware VMEM budgets: (input-tile budget, compiler vmem limit).

    v7x has only 64 MiB physical VMEM per TensorCore -> ~32 MiB of double-
    buffered input tiles with a 48 MiB scoped limit; v5e/v6e have 128 MiB
    physical -> ~64 MiB of tiles with a 96 MiB limit.
    """
    cap = 64 << 20  # conservative fallback = v7x per-core VMEM
    try:
        cap = int(pltpu.get_tpu_info().vmem_capacity_bytes)
    except Exception:
        pass
    input_budget = min(cap // 2, 64 << 20)
    vmem_limit = min(cap * 3 // 4, 96 << 20)
    return input_budget, vmem_limit


def _tile_plan(R, S, p_bytes, g_bytes, input_budget):
    """Choose (TR, TS, row blocks, spatial chunks) from the VMEM budget."""
    bytes_per_elem = p_bytes + g_bytes
    align = max(8, 32 // min(p_bytes, g_bytes))     # f32: 8, bf16: 16, int8: 32
    pair_budget = max(1, input_budget // 2)         # one pipeline stage (p + g)

    # Row (sublane) tile: full extent (always legal) or a 32-multiple cap.
    TR = R if R <= 256 else 256

    # Spatial (lane) tile from the budget.
    if S <= 128:
        TS = S                                      # full extent (always legal)
    else:
        ts_budget = max(128, pair_budget // (TR * bytes_per_elem) // 128 * 128)
        TS = min(_round_up(S, 128), ts_budget)

    nr = _cdiv(R, TR)
    if nr >= 2:
        nchunk = 1
        if TS >= S:
            # Single spatial block: spend leftover budget on rows, but keep
            # >= 2 row blocks so both v7x TensorCores stay busy.
            tr_budget = pair_budget // (TS * bytes_per_elem) // align * align
            tr_cap = _round_up(_cdiv(R, 2), align)
            TR = max(TR, min(tr_cap, tr_budget))
            nr = _cdiv(R, TR)
    else:
        # Small R (one row block): split the spatial reduction into two
        # parallel chunks so both v7x TensorCores get work.
        if S > 128:
            TS = min(TS, _round_up(_cdiv(S, 2), 128))
        nchunk = 2 if _cdiv(S, TS) >= 2 else 1

    sb_total = _cdiv(S, TS)
    sb_per_chunk = _cdiv(sb_total, nchunk)
    return TR, TS, nr, nchunk, sb_total, sb_per_chunk


def _partials_kernel(p_ref, g_ref, out_ref, *, s_total, ts, sb_per_chunk,
                     needs_mask):
    """Accumulate per-row [sum(p*g), sum(p), sum(g)] over the spatial grid axis."""
    c = pl.program_id(0)          # spatial chunk (parallel)
    s = pl.program_id(2)          # spatial block within chunk (reduction)

    p = p_ref[...].astype(jnp.float32)      # (TR, TS)
    g = g_ref[...].astype(jnp.float32)      # (TR, TS)  (mirrors `1.0 * g`)

    if needs_mask:
        # Zero out-of-range lanes of overhanging / phantom edge blocks.  The
        # un-clamped logical column offset of this tile is (c*spc + s) * ts.
        col0 = (c * sb_per_chunk + s) * ts
        lane = lax.broadcasted_iota(jnp.int32, p.shape, 1)
        valid = lane < (s_total - col0)
        p = jnp.where(valid, p, 0.0)
        g = jnp.where(valid, g, 0.0)

    tp = jnp.sum(p * g, axis=-1, keepdims=True)   # (TR, 1)
    sp = jnp.sum(p, axis=-1, keepdims=True)       # (TR, 1)
    gs = jnp.sum(g, axis=-1, keepdims=True)       # (TR, 1)

    @pl.when(s == 0)
    def _():
        out_ref[...] = jnp.zeros_like(out_ref)

    out_ref[0, :, 0:1] += tp
    out_ref[0, :, 1:2] += sp
    out_ref[0, :, 2:3] += gs


def generalized_tversky_loss(p, g, *, alpha=0.3, beta=0.7, smooth=1e-5,
                             batch_tversky=False):
    """p, g: (N, C, *spatial) arrays (nDims = 1/2/3). Returns scalar f32 loss."""
    assert p.shape == g.shape
    assert p.ndim in (3, 4, 5), "expected (N, C, *spatial) with 1/2/3 spatial dims"
    assert abs(alpha + beta - 1.0) < 1e-6

    if g.dtype == jnp.bool_:
        g = g.astype(p.dtype)     # mirrors `1.0 * g` in the reference

    N, C = p.shape[0], p.shape[1]
    S = int(np.prod(p.shape[2:]))
    R = N * C

    p2 = p.reshape(R, S)
    g2 = g.reshape(R, S)

    input_budget, vmem_limit = _vmem_budget_bytes()
    p_bytes = jnp.dtype(p.dtype).itemsize
    g_bytes = jnp.dtype(g.dtype).itemsize
    TR, TS, nr, nchunk, sb_total, sb_per_chunk = _tile_plan(
        R, S, p_bytes, g_bytes, input_budget)

    needs_clamp = sb_per_chunk * nchunk != sb_total     # phantom trailing blocks
    needs_mask = (S % TS != 0) or needs_clamp

    if needs_clamp:
        def in_map(c, r, s):
            return (r, jnp.minimum(c * sb_per_chunk + s, sb_total - 1))
    else:
        def in_map(c, r, s):
            return (r, c * sb_per_chunk + s)

    in_spec = pl.BlockSpec((TR, TS), in_map)
    out_spec = pl.BlockSpec((1, TR, 3), lambda c, r, s: (c, r, 0))

    kernel = functools.partial(
        _partials_kernel,
        s_total=S, ts=TS, sb_per_chunk=sb_per_chunk, needs_mask=needs_mask)

    part = pl.pallas_call(
        kernel,
        out_shape=jax.ShapeDtypeStruct((nchunk, R, 3), jnp.float32),
        grid_spec=pltpu.PrefetchScalarGridSpec(
            num_scalar_prefetch=0,
            grid=(nchunk, nr, sb_per_chunk),
            in_specs=[in_spec, in_spec],
            out_specs=out_spec,
        ),
        compiler_params=pltpu.CompilerParams(
            # chunk & row axes are independent (megacore-shardable); the
            # spatial axis accumulates into the resident output block.
            dimension_semantics=("parallel", "parallel", "arbitrary"),
            vmem_limit_bytes=int(vmem_limit),
        ),
    )(p2, g2)

    # --- Tiny O(N*C) epilogue in plain JAX ---
    part = part.sum(axis=0)                 # (R, 3): [TP, sum(p), sum(g)]
    tp = part[:, 0].reshape(N, C)
    sp = part[:, 1].reshape(N, C)
    gsum = part[:, 2].reshape(N, C)

    if batch_tversky:                        # sumDims includes the batch dim
        tp, sp, gsum = tp.sum(axis=0), sp.sum(axis=0), gsum.sum(axis=0)

    fp = sp - tp
    fn = gsum - tp
    w = 1.0 / (gsum + smooth) ** 2
    num = (w * tp).sum(axis=-1)
    den = (w * (tp + alpha * fp + beta * fn)).sum(axis=-1)
    tversky = ((num + smooth) / (den + smooth)).mean()
    return (1.0 - tversky).astype(jnp.float32)


def _reference_loss(p, g, *, alpha=0.3, beta=0.7, smooth=1e-5):
    # Pure-JAX mirror of the PyTorch forward (batchTversky=False).
    sum_dims = tuple(range(2, p.ndim))
    g = 1.0 * g
    TP = (p * g).sum(axis=sum_dims)
    FP = (p * (1 - g)).sum(axis=sum_dims)
    FN = ((1 - p) * g).sum(axis=sum_dims)
    w = 1.0 / (g.sum(axis=sum_dims) + smooth) ** 2
    num = (w * TP).sum(axis=-1)
    den = (w * (TP + alpha * FP + beta * FN)).sum(axis=-1)
    tversky = ((num + smooth) / (den + smooth)).mean()
    return 1.0 - tversky


if __name__ == "__main__":
    key = jax.random.PRNGKey(0)
    kp, kg, kp2, kg2 = jax.random.split(key, 4)

    # Primary case: N=2, C=4, 16x16 spatial (nDims=2).
    N, C, H, W = 2, 4, 16, 16
    p = jax.nn.sigmoid(jax.random.normal(kp, (N, C, H, W), dtype=jnp.float32))
    g = (jax.random.uniform(kg, (N, C, H, W)) > 0.5).astype(jnp.float32)

    loss = jax.block_until_ready(generalized_tversky_loss(p, g))
    ref = jax.block_until_ready(_reference_loss(p, g))
    assert np.allclose(np.asarray(loss), np.asarray(ref), rtol=1e-5, atol=1e-6), (
        loss, ref)

    # Ragged case: exercises the no-pad edge-block masking (S % 128 != 0).
    p2 = jax.nn.sigmoid(jax.random.normal(kp2, (2, 3, 7, 19), dtype=jnp.float32))
    g2 = (jax.random.uniform(kg2, (2, 3, 7, 19)) > 0.5).astype(jnp.float32)
    loss2 = jax.block_until_ready(generalized_tversky_loss(p2, g2))
    ref2 = jax.block_until_ready(_reference_loss(p2, g2))
    assert np.allclose(np.asarray(loss2), np.asarray(ref2), rtol=1e-5, atol=1e-6), (
        loss2, ref2)

    print("KERNEL_OK")
</pallas_src>

<mosaic_0001>
module attributes {stable_mosaic.version = 11 : i64} {
  func.func @_partials_kernel(%arg0: i32, %arg1: i32, %arg2: i32, %arg3: memref<8x128xf32, #tpu.memory_space<vmem>>, %arg4: memref<8x128xf32, #tpu.memory_space<vmem>>, %arg5: memref<1x8x3xf32, #tpu.memory_space<vmem>>) attributes {dimension_semantics = [#tpu.dimension_semantics<parallel>, #tpu.dimension_semantics<parallel>, #tpu.dimension_semantics<arbitrary>], iteration_bounds = array<i64: 2, 1, 1>, scalar_prefetch = 0 : i64, scratch_operands = 0 : i64, tpu.core_type = #tpu.core_type<tc>, window_params = [{transform_indices = @transform_0, window_bounds = array<i64: 8, 128>}, {transform_indices = @transform_1, window_bounds = array<i64: 8, 128>}, {transform_indices = @transform_2, window_bounds = array<i64: 1, 8, 3>}]} {
    %c0 = arith.constant 0 : index
    %c0_0 = arith.constant 0 : index
    %0 = vector.load %arg3[%c0, %c0_0] : memref<8x128xf32, #tpu.memory_space<vmem>>, vector<8x128xf32>
    %c0_1 = arith.constant 0 : index
    %c0_2 = arith.constant 0 : index
    %1 = vector.load %arg4[%c0_1, %c0_2] : memref<8x128xf32, #tpu.memory_space<vmem>>, vector<8x128xf32>
    %2 = arith.mulf %0, %1 : vector<8x128xf32>
    %cst = arith.constant dense<0.000000e+00> : vector<8xf32>
    %3 = vector.multi_reduction <add>, %2, %cst [1] : vector<8x128xf32> to vector<8xf32>
    %4 = vector.shape_cast %3 : vector<8xf32> to vector<8x1xf32>
    %cst_3 = arith.constant dense<0.000000e+00> : vector<8xf32>
    %5 = vector.multi_reduction <add>, %0, %cst_3 [1] : vector<8x128xf32> to vector<8xf32>
    %6 = vector.shape_cast %5 : vector<8xf32> to vector<8x1xf32>
    %cst_4 = arith.constant dense<0.000000e+00> : vector<8xf32>
    %7 = vector.multi_reduction <add>, %1, %cst_4 [1] : vector<8x128xf32> to vector<8xf32>
    %8 = vector.shape_cast %7 : vector<8xf32> to vector<8x1xf32>
    %c0_i32 = arith.constant 0 : i32
    %9 = arith.cmpi eq, %arg2, %c0_i32 : i32
    %10 = arith.extui %9 : i1 to i32
    %c0_i32_5 = arith.constant 0 : i32
    %11 = arith.cmpi ne, %10, %c0_i32_5 : i32
    scf.if %11 {
      %cst_22 = arith.constant 0.000000e+00 : f32
      %30 = vector.broadcast %cst_22 : f32 to vector<1x8x3xf32>
      %c0_23 = arith.constant 0 : index
      %c0_24 = arith.constant 0 : index
      %c0_25 = arith.constant 0 : index
      %31 = vector.load %arg5[%c0_23, %c0_24, %c0_25] : memref<1x8x3xf32, #tpu.memory_space<vmem>>, vector<1x8x3xf32>
      tpu.vector_store %arg5[%c0_23, %c0_24, %c0_25], %30 {strides = array<i32>} : memref<1x8x3xf32, #tpu.memory_space<vmem>>, vector<1x8x3xf32>,
    } else {
    }
    %c0_6 = arith.constant 0 : index
    %c0_7 = arith.constant 0 : index
    %c0_8 = arith.constant 0 : index
    %12 = vector.load %arg5[%c0_6, %c0_7, %c0_8] : memref<1x8x3xf32, #tpu.memory_space<vmem>>, vector<1x8x1xf32>
    %13 = vector.shape_cast %12 : vector<1x8x1xf32> to vector<8x1xf32>
    %14 = arith.addf %13, %4 : vector<8x1xf32>
    %c0_9 = arith.constant 0 : index
    %c0_10 = arith.constant 0 : index
    %c0_11 = arith.constant 0 : index
    %15 = vector.load %arg5[%c0_9, %c0_10, %c0_11] : memref<1x8x3xf32, #tpu.memory_space<vmem>>, vector<1x8x1xf32>
    %16 = vector.shape_cast %15 : vector<1x8x1xf32> to vector<8x1xf32>
    %17 = vector.shape_cast %14 : vector<8x1xf32> to vector<1x8x1xf32>
    tpu.vector_store %arg5[%c0_9, %c0_10, %c0_11], %17 {strides = array<i32>} : memref<1x8x3xf32, #tpu.memory_space<vmem>>, vector<1x8x1xf32>,
    %c0_12 = arith.constant 0 : index
    %c0_13 = arith.constant 0 : index
    %c1 = arith.constant 1 : index
    %18 = vector.load %arg5[%c0_12, %c0_13, %c1] : memref<1x8x3xf32, #tpu.memory_space<vmem>>, vector<1x8x1xf32>
    %19 = vector.shape_cast %18 : vector<1x8x1xf32> to vector<8x1xf32>
    %20 = arith.addf %19, %6 : vector<8x1xf32>
    %c0_14 = arith.constant 0 : index
    %c0_15 = arith.constant 0 : index
    %c1_16 = arith.constant 1 : index
    %21 = vector.load %arg5[%c0_14, %c0_15, %c1_16] : memref<1x8x3xf32, #tpu.memory_space<vmem>>, vector<1x8x1xf32>
    %22 = vector.shape_cast %21 : vector<1x8x1xf32> to vector<8x1xf32>
    %23 = vector.shape_cast %20 : vector<8x1xf32> to vector<1x8x1xf32>
    tpu.vector_store %arg5[%c0_14, %c0_15, %c1_16], %23 {strides = array<i32>} : memref<1x8x3xf32, #tpu.memory_space<vmem>>, vector<1x8x1xf32>,
    %c0_17 = arith.constant 0 : index
    %c0_18 = arith.constant 0 : index
    %c2 = arith.constant 2 : index
    %24 = vector.load %arg5[%c0_17, %c0_18, %c2] : memref<1x8x3xf32, #tpu.memory_space<vmem>>, vector<1x8x1xf32>
    %25 = vector.shape_cast %24 : vector<1x8x1xf32> to vector<8x1xf32>
    %26 = arith.addf %25, %8 : vector<8x1xf32>
    %c0_19 = arith.constant 0 : index
    %c0_20 = arith.constant 0 : index
    %c2_21 = arith.constant 2 : index
    %27 = vector.load %arg5[%c0_19, %c0_20, %c2_21] : memref<1x8x3xf32, #tpu.memory_space<vmem>>, vector<1x8x1xf32>
    %28 = vector.shape_cast %27 : vector<1x8x1xf32> to vector<8x1xf32>
    %29 = vector.shape_cast %26 : vector<8x1xf32> to vector<1x8x1xf32>
    tpu.vector_store %arg5[%c0_19, %c0_20, %c2_21], %29 {strides = array<i32>} : memref<1x8x3xf32, #tpu.memory_space<vmem>>, vector<1x8x1xf32>,
    return
  }
  func.func @transform_0(%arg0: i32, %arg1: i32, %arg2: i32) -> (i32, i32) {
    %c1_i32 = arith.constant 1 : i32
    %0 = arith.muli %arg0, %c1_i32 : i32
    %1 = arith.addi %0, %arg2 : i32
    %c0_i32 = arith.constant 0 : i32
    return %arg1, %1 : i32, i32
  }
  func.func @transform_1(%arg0: i32, %arg1: i32, %arg2: i32) -> (i32, i32) {
    %c1_i32 = arith.constant 1 : i32
    %0 = arith.muli %arg0, %c1_i32 : i32
    %1 = arith.addi %0, %arg2 : i32
    %c0_i32 = arith.constant 0 : i32
    return %arg1, %1 : i32, i32
  }
  func.func @transform_2(%arg0: i32, %arg1: i32, %arg2: i32) -> (i32, i32, i32) {
    %c0_i32 = arith.constant 0 : i32
    %c0_i32_0 = arith.constant 0 : i32
    return %arg0, %arg1, %c0_i32 : i32, i32, i32
  }
}

</mosaic_0001>

<bundles_post_ra>
// kernel: tpu_custom_call.1
= control target key start
LH: loop header
LB: loop body
LE: loop exit
PB: predicated region body
PF: predicated region fallthrough
CT: control target
= control target key end

     0   :  { %7 = vsyncpa [#allocation3], 0  ;;  %s687_s0 = inlined_call_operand.hbm [shape: f32[8,256], index: 0, kind: input, shape index: {}]   ;;  %s688_s1 = inlined_call_operand.hbm [shape: f32[8,256], index: 1, kind: input, shape index: {}]   ;;  %s689_s2 = inlined_call_operand.vmem [shape: f32[2,8,3], index: 2, kind: output, shape index: {}]  }
   0x1   :  { %9 = vsyncpa [#allocation3 + $0x1], 0 }
   0x2   :  { %10 = vsyncpa [#allocation5], 0 }
   0x3   :  { %12 = vsyncpa [#allocation5 + $0x1], 0  ;;  %s592_s9 = smov 0   ;;  %s594_s10 = smov 0  }
   0x4   :  { %s596_s11 = smov 0   ;;  %s598_s12 = smov 0  }
   0x5   :  { %s600_s13 = smov 0   ;;  %s602_s14 = smov 0  }
   0x6 LB: > { %s385_s15 = sadd.s32 4294967295, %s574_s14   ;;  %s37_s16 = sadd.s32 1, %s570_s13  ;;  %s574_s14 = sphi %s602_s14, %s18_s14   ;;  %s570_s13 = sphi %s600_s13, %s696_s13   ;;  %s566_s12 = sphi %s598_s12, %s695_s12   ;;  %s562_s11 = sphi %s596_s11, %s694_s11   ;;  %s558_s10 = sphi %s594_s10, %s693_s10   ;;  %s554_s9 = sphi %s592_s9, %s692_s9  }
   0x7   : > { %p39_p0 = scmp.ge.s32.totalorder %s37_s16, 2  ;;  %s48_s17 = sadd.s32 1, %s562_s11 }
   0x8   : > { %p55_p1 = scmp.ne.s32.totalorder %s562_s11, %s558_s10  ;;  %p56_p2 = scmp.eq.s32.totalorder %s574_s14, 0 }
   0x9   : > { %s698_s16 = smov (%p39_p0, %s37_s16), 0  ;;  %p61_p4 = scmp.ne.s32.totalorder %s558_s10, %s554_s9 }
   0xa   : > { %p628_p3 = por %p56_p2, %p55_p1  ;;  %s44_s19 = ssub.s32 %s570_s13, %s698_s16 }
   0xb   : > { %p62_p5 = scmp.eq.s32.totalorder %s385_s15, 0  ;;  %p46_p6 = scmp.eq.s32.totalorder %s44_s19, 0 }
   0xc   : > { %p410_p8 = scmp.lt.s32.totalorder %s574_s14, 2  ;;  %s143_s22 = sand.u32 1, %s562_s11  }
   0xd   : > { %p635_p7 = por %p62_p5, %p61_p4  ;;  %s390_s23 = sshll.u32 %s570_s13, 3 }
   0xe   : > { %s641_s21 = scalar_select %p46_p6, %s562_s11, %s48_s17  }
   0xf   : > { %s389_s24 = sshll.u32 %s143_s22, 3  ;;  %s154_s27 = scalar_lea.hbm %s687_s0, %s390_s23 }
  0x10   : > { %s156_s28 = sshll.u32 %s154_s27, 4  ;;  %s147_s29 = scalar_lea.vmem [#allocation2], %s389_s24  ;;  %s157_s28 = int_to_ptr.hbm [resolvable:$true] %s156_s28 }
  0x11   : > { %s158_s30 = sshll.u32 %s147_s29, 4  ;;  %p404_p9 = pnand %p410_p8, %p628_p3  ;;  %s159_s30 = int_to_ptr.vmem [resolvable:$true] %s158_s30 }
  0x12   : > { %p393_p10 = scmp.ge.s32.totalorder %s574_s14, 1  ;;  %p185_p11 = scmp.lt.s32.totalorder %s574_s14, 3 }
  0x13   : > { %s144_s3 = scalar_lea.sflag [#allocation3], %s143_s22  ;;  %s176_s6 = scalar_lea.hbm %s688_s1, %s390_s23 }
  0x14   : > { %406 = dma.hbm_to_vmem [thread:$0]  (!%p404_p9), %s157_s28, 128, %s159_s30, %s144_s3  }
  0x15   : > { %p186_p12 = pnand %p393_p10, %p185_p11  ;;  %s178_s7 = sshll.u32 %s176_s6, 4  ;;  %s179_s7 = int_to_ptr.hbm [resolvable:$true] %s178_s7 }
  0x16   : > { %s169_s8 = scalar_lea.vmem [#allocation4], %s389_s24  ;;  %s166_s15 = scalar_lea.sflag [#allocation5], %s143_s22 }
  0x17   : > { %s180_s9 = sshll.u32 %s169_s8, 4  ;;  %189 = sbr.rel (%p186_p12) target bundleno = 173 (0xad), region = 28  ;;  %s181_s9 = int_to_ptr.vmem [resolvable:$true] %s180_s9 }
  0x18   : > { %409 = dma.hbm_to_vmem [thread:$0]  (!%p404_p9), %s179_s7, 128, %s181_s9, %s166_s15  }
  0x19   : > { %s191_s17 = sand.u32 (!%p186_p12), 1, %s558_s10  }
  0x1a   : > { %s394_s18 = sshll.u32 (!%p186_p12), %s191_s17, 3  ;;  %s192_s19 = scalar_lea.sflag (!%p186_p12), [#allocation3], %s191_s17 }
  0x1b   : > { %s195_s25 = scalar_lea.vmem (!%p186_p12), [#allocation2], %s394_s18 }
  0x1c   : > { %545 = dma.done.wait (%p635_p7), %s192_s19, 128  }
  0x1d   : > { %547 = vsyncadd (%p635_p7), %s192_s19, 4294967168  ;;  %s202_s23 = scalar_lea.sflag [#allocation5], %s191_s17  ;;  %s205_s24 = scalar_lea.vmem [#allocation4], %s394_s18 }
  0x1e   : > { %549 = dma.done.wait (%p635_p7), %s202_s23, 128  }
  0x1f   : > { %551 = vsyncadd (%p635_p7), %s202_s23, 4294967168  ;;  %p236_p13 = scmp.lt.s32.totalorder %s566_s12, 1  ;;  %vm256_vm0 = vcmask 23552   ;;  %v576_v0 = vmov 0.0   ;;  %v243_v1 = vld [vmem:[%s195_s25] sm:$0xff]  ;;  %v244_v2 = vld [vmem:[%s205_s24] sm:$0xff] }
  0x20   : > { %v245_v3 = vmul.f32 %v244_v2, %v243_v1  ;;  %250 = vadd.xlane.f32.xlu1 %v244_v2  ;;  %vm260_vm1 = vcmask 7168   ;;  %vm264_vm2 = vcmask 15368   ;;  %vm268_vm3 = vcmask 23568  }
  0x21   : > { %s700_s12 = smov (!%p236_p13, %s566_s12), 1 }
  0x22   : > { %s396_s22 = sshll.u32 %s700_s12, 3  ;;  %246 = vadd.xlane.f32.xlu0 %v245_v3 }
  0x23   : > { %s242_s28 = scalar_lea.vmem %s689_s2, %s396_s22 }
  0x24   : > { %257 = vst.msk [vmem:[%s242_s28] sm:$0xff] %vm256_vm0, %v576_v0 }
  0x2a   : > { %248 = vadd.xlane.f32.xlu0 %v243_v1 }
  0x2b   : > { %v258_v4 = vld [vmem:[%s242_s28] sm:$0xff] }
  0x93   : > { %v251_v10 = vpop.xlane.xlu1 %250 }
  0x95   : > { %v247_v5 = vpop.xlane.xlu0 %246 }
  0x96   : > { %v259_v6 = vadd.f32 %v258_v4, %v247_v5 }
  0x98   : > { %261 = vst.msk [vmem:[%s242_s28] sm:$0xff] %vm260_vm1, %v259_v6 }
  0x9d   : > { %v249_v7 = vpop.xlane.xlu0 %248 }
  0x9f   : > { %v262_v8 = vld [vmem:[%s242_s28] sm:$0xff] }
  0xa0   : > { %v263_v9 = vadd.f32 %v262_v8, %v249_v7 }
  0xa2   : > { %265 = vst.msk [vmem:[%s242_s28] sm:$0xff] %vm264_vm2, %v263_v9 }
  0xa9   : > { %v266_v11 = vld [vmem:[%s242_s28] sm:$0xff] }
  0xaa   : > { %v267_v12 = vadd.f32 %v266_v11, %v251_v10 }
  0xac   : > { %269 = vst.msk [vmem:[%s242_s28] sm:$0xff] %vm268_vm3, %v267_v12 }
  0xad PF: > { %s18_s14 = sadd.s32 1, %s574_s14   ;;  %s692_s9 = smov %s558_s10 }
  0xae   : > { %p15_p0 = scmp.ge.s32.totalorder %s18_s14, 4   ;;  %s693_s10 = smov %s562_s11 }
  0xaf   : > { %s694_s11 = smov %s641_s21  ;;  %s695_s12 = smov %s570_s13 }
  0xb0   : > { %s696_s13 = smov %s698_s16  ;;  %17 = sbr.rel (!%p15_p0) target bundleno = 6 (0x6), region = 85 }
  0xb5   :  { %295 = vsyncpa [#allocation3], 1 }
  0xb6   :  { %297 = vsyncpa [#allocation3 + $0x1], 1 }
  0xb7   :  { %298 = vsyncpa [#allocation5], 1 }
  0xb8   :  { %300 = vsyncpa [#allocation5 + $0x1], 1 }

</bundles_post_ra>
